<compile_context>
chip_gen: v7x
topology: tpu7x:2x2x1
jax: 0.10.0
libtpu: 0.0.40
codegen_flags: <defaults>
</compile_context>

<pallas_src>
import jax
import jax.numpy as jnp
from jax.experimental import pallas as pl
from jax.experimental.pallas import tpu as pltpu


def cbow_kernel(ids_ref, emb_hbm, w_ref, b_ref, out_ref, rows_ref, sems):
    """ids_ref: SMEM i32 [C]; emb_hbm: HBM f32 [V, D] (pl.ANY, manual DMA);
    w_ref: VMEM bf16 [D, V]; b_ref: VMEM f32 [1, V]; out_ref: VMEM f32 [1, V];
    rows_ref: VMEM f32 [C, D] scratch; sems: DMA semaphores [C]."""
    C, _ = rows_ref.shape

    # Gather the C needed embedding rows straight from HBM with C concurrent
    # row DMAs, issued back-to-back so they overlap each other (and any
    # remaining prologue weight/bias traffic).  Scalar id reads all happen
    # before the first .wait() so SMEM sst->sld forwarding stays intact.
    copies = []
    for i in range(C):
        cp = pltpu.make_async_copy(
            emb_hbm.at[pl.ds(ids_ref[i], 1)],       # [1, D] row in HBM
            rows_ref.at[pl.ds(i, 1)],               # [1, D] slot in VMEM scratch
            sems.at[i],
        )
        cp.start()
        copies.append(cp)
    for cp in copies:
        cp.wait()

    # torch.sum(embeds, dim=0): one sublane reduce over the gathered rows
    # (no serialized scalar-indexed add chain), accumulated in f32.
    acc = jnp.sum(rows_ref[...], axis=0, keepdims=True)          # [1, D] f32

    # Decoder linear on the MXU: bf16 x bf16 -> f32 accumulate, natural
    # [M,K]x[K,N] orientation (weight stored persistently as [D, V]).
    logits = jnp.dot(acc.astype(w_ref.dtype), w_ref[...],
                     preferred_element_type=jnp.float32)          # [1, V]
    logits = logits + b_ref[...]

    # Numerically stable log_softmax over the lane-dense vocab axis.
    m = jnp.max(logits, axis=-1, keepdims=True)
    shifted = logits - m
    lse = jnp.log(jnp.sum(jnp.exp(shifted), axis=-1, keepdims=True))
    out_ref[...] = (shifted - lse).astype(out_ref.dtype)


def cbow_forward(inputs, emb_table, dec_weight_dv, dec_bias):
    """inputs: int [C]; emb_table: f32 [V, D] (stays in HBM, rows gathered);
    dec_weight_dv: bf16 [D, V] (pre-transposed once at param prep);
    dec_bias: f32 [V]."""
    C = inputs.shape[0]
    V, D = emb_table.shape
    assert dec_weight_dv.shape == (D, V)

    # Manual in-kernel DMAs have no runtime bounds check: clamp ids here.
    ids = jnp.clip(inputs.astype(jnp.int32), 0, V - 1)
    bias2d = dec_bias.reshape(1, V).astype(jnp.float32)

    cost = pl.CostEstimate(
        flops=2 * D * V + C * D,
        transcendentals=V,                 # exp in log_softmax
        bytes_accessed=(C * D * 4          # gathered embedding rows (f32)
                        + D * V * 2        # decoder weight stream (bf16)
                        + V * 4            # bias
                        + V * 4            # log-probs out
                        + C * 4),          # ids
    )

    return pl.pallas_call(
        cbow_kernel,
        out_shape=jax.ShapeDtypeStruct((1, V), jnp.float32),
        in_specs=[
            pl.BlockSpec(memory_space=pltpu.MemorySpace.SMEM),   # context ids drive the gather
            pl.BlockSpec(memory_space=pl.ANY),                   # embedding table stays in HBM
            pl.BlockSpec(memory_space=pltpu.MemorySpace.VMEM),   # decode weight [D, V] bf16
            pl.BlockSpec(memory_space=pltpu.MemorySpace.VMEM),   # decode bias [1, V] f32
        ],
        out_specs=pl.BlockSpec(memory_space=pltpu.MemorySpace.VMEM),
        scratch_shapes=[
            pltpu.VMEM((C, D), jnp.float32),      # gathered rows
            pltpu.SemaphoreType.DMA((C,)),        # one sem per row DMA
        ],
        cost_estimate=cost,
    )(ids, emb_table, dec_weight_dv, bias2d)


def prepare_decoder_params(dec_weight_vd, dec_bias):
    """One-time parameter prep (outside the per-call path): torch [V, D] weight
    -> [D, V] bf16 stream; bias stays f32."""
    return jnp.asarray(dec_weight_vd.T, dtype=jnp.bfloat16), dec_bias.astype(jnp.float32)


def cbow_reference(inputs, emb_table, dec_weight_dv, dec_bias):
    embeds = jnp.take(emb_table, inputs, axis=0)                  # [C, D]
    add_embeds = jnp.sum(embeds, axis=0).reshape(1, -1)           # [1, D]
    out = add_embeds @ dec_weight_dv.astype(jnp.float32) + dec_bias[None, :]
    return jax.nn.log_softmax(out, axis=1)


if __name__ == "__main__":
    vocab_size = 512
    embedding_dim = 128
    context_size = 8

    key = jax.random.PRNGKey(0)
    k_ids, k_emb, k_w, k_b = jax.random.split(key, 4)

    # Deterministic synthetic parameters (shapes from nn.Embedding / nn.Linear).
    inputs = jax.random.randint(k_ids, (context_size,), 0, vocab_size, dtype=jnp.int32)
    emb_table = jax.random.normal(k_emb, (vocab_size, embedding_dim), dtype=jnp.float32)
    dec_weight = (jax.random.normal(k_w, (vocab_size, embedding_dim), dtype=jnp.float32)
                  * (1.0 / jnp.sqrt(embedding_dim)))
    dec_bias = jax.random.normal(k_b, (vocab_size,), dtype=jnp.float32) * 0.01

    dec_weight_dv, dec_bias_f32 = prepare_decoder_params(dec_weight, dec_bias)

    log_probs = cbow_forward(inputs, emb_table, dec_weight_dv, dec_bias_f32)
    log_probs = jax.block_until_ready(log_probs)

    ref = cbow_reference(inputs, emb_table, dec_weight_dv, dec_bias_f32)
    assert log_probs.shape == (1, vocab_size)
    # Tolerance loosened from 1e-4: decoder matmul runs bf16 x bf16 on the MXU
    # (activation cast to bf16), reference uses the same bf16-rounded weight.
    assert jnp.allclose(log_probs, ref, atol=3e-2, rtol=3e-2), "mismatch vs JAX reference"

    print("KERNEL_OK")
</pallas_src>

<mosaic_0001>
module attributes {stable_mosaic.version = 11 : i64} {
  func.func @cbow_kernel(%arg0: memref<8xi32, #tpu.memory_space<smem>>, %arg1: memref<512x128xf32, #tpu.memory_space<any>>, %arg2: memref<128x512xbf16, #tpu.memory_space<vmem>>, %arg3: memref<1x512xf32, #tpu.memory_space<vmem>>, %arg4: memref<1x512xf32, #tpu.memory_space<vmem>>, %arg5: memref<8x128xf32, #tpu.memory_space<vmem>>, %arg6: memref<8x!tpu.dma_semaphore, #tpu.memory_space<semaphore_mem>>) attributes {dimension_semantics = [], scalar_prefetch = 0 : i64, scratch_operands = 2 : i64, tpu.core_type = #tpu.core_type<tc>} {
    %c0 = arith.constant 0 : index
    %0 = memref.load %arg0[%c0] : memref<8xi32, #tpu.memory_space<smem>>
    %c0_i32 = arith.constant 0 : i32
    %c0_i32_0 = arith.constant 0 : i32
    %1 = tpu.memref_slice %arg1[%0, %c0_i32_0] : memref<512x128xf32, #tpu.memory_space<any>> -> memref<1x128xf32, #tpu.memory_space<any>>
    %c0_i32_1 = arith.constant 0 : i32
    %c0_i32_2 = arith.constant 0 : i32
    %2 = tpu.memref_slice %arg5[%c0_i32_1, %c0_i32_2] : memref<8x128xf32, #tpu.memory_space<vmem>> -> memref<1x128xf32, #tpu.memory_space<vmem>>
    %3 = tpu.memref_slice %arg6[%c0_i32] : memref<8x!tpu.dma_semaphore, #tpu.memory_space<semaphore_mem>> -> memref<1x!tpu.dma_semaphore, #tpu.memory_space<semaphore_mem>>
    %4 = tpu.memref_squeeze %3 : memref<1x!tpu.dma_semaphore, #tpu.memory_space<semaphore_mem>> -> memref<!tpu.dma_semaphore, #tpu.memory_space<semaphore_mem>>
    tpu.enqueue_dma source(%1 : memref<1x128xf32, #tpu.memory_space<any>>) target(%2 : memref<1x128xf32, #tpu.memory_space<vmem>>) target_semaphore(%4 : memref<!tpu.dma_semaphore, #tpu.memory_space<semaphore_mem>>)
    %c1 = arith.constant 1 : index
    %5 = memref.load %arg0[%c1] : memref<8xi32, #tpu.memory_space<smem>>
    %c1_i32 = arith.constant 1 : i32
    %c0_i32_3 = arith.constant 0 : i32
    %6 = tpu.memref_slice %arg1[%5, %c0_i32_3] : memref<512x128xf32, #tpu.memory_space<any>> -> memref<1x128xf32, #tpu.memory_space<any>>
    %c1_i32_4 = arith.constant 1 : i32
    %c0_i32_5 = arith.constant 0 : i32
    %7 = tpu.memref_slice %arg5[%c1_i32_4, %c0_i32_5] : memref<8x128xf32, #tpu.memory_space<vmem>> -> memref<1x128xf32, #tpu.memory_space<vmem>>
    %8 = tpu.memref_slice %arg6[%c1_i32] : memref<8x!tpu.dma_semaphore, #tpu.memory_space<semaphore_mem>> -> memref<1x!tpu.dma_semaphore, #tpu.memory_space<semaphore_mem>>
    %9 = tpu.memref_squeeze %8 : memref<1x!tpu.dma_semaphore, #tpu.memory_space<semaphore_mem>> -> memref<!tpu.dma_semaphore, #tpu.memory_space<semaphore_mem>>
    tpu.enqueue_dma source(%6 : memref<1x128xf32, #tpu.memory_space<any>>) target(%7 : memref<1x128xf32, #tpu.memory_space<vmem>>) target_semaphore(%9 : memref<!tpu.dma_semaphore, #tpu.memory_space<semaphore_mem>>)
    %c2 = arith.constant 2 : index
    %10 = memref.load %arg0[%c2] : memref<8xi32, #tpu.memory_space<smem>>
    %c2_i32 = arith.constant 2 : i32
    %c0_i32_6 = arith.constant 0 : i32
    %11 = tpu.memref_slice %arg1[%10, %c0_i32_6] : memref<512x128xf32, #tpu.memory_space<any>> -> memref<1x128xf32, #tpu.memory_space<any>>
    %c2_i32_7 = arith.constant 2 : i32
    %c0_i32_8 = arith.constant 0 : i32
    %12 = tpu.memref_slice %arg5[%c2_i32_7, %c0_i32_8] : memref<8x128xf32, #tpu.memory_space<vmem>> -> memref<1x128xf32, #tpu.memory_space<vmem>>
    %13 = tpu.memref_slice %arg6[%c2_i32] : memref<8x!tpu.dma_semaphore, #tpu.memory_space<semaphore_mem>> -> memref<1x!tpu.dma_semaphore, #tpu.memory_space<semaphore_mem>>
    %14 = tpu.memref_squeeze %13 : memref<1x!tpu.dma_semaphore, #tpu.memory_space<semaphore_mem>> -> memref<!tpu.dma_semaphore, #tpu.memory_space<semaphore_mem>>
    tpu.enqueue_dma source(%11 : memref<1x128xf32, #tpu.memory_space<any>>) target(%12 : memref<1x128xf32, #tpu.memory_space<vmem>>) target_semaphore(%14 : memref<!tpu.dma_semaphore, #tpu.memory_space<semaphore_mem>>)
    %c3 = arith.constant 3 : index
    %15 = memref.load %arg0[%c3] : memref<8xi32, #tpu.memory_space<smem>>
    %c3_i32 = arith.constant 3 : i32
    %c0_i32_9 = arith.constant 0 : i32
    %16 = tpu.memref_slice %arg1[%15, %c0_i32_9] : memref<512x128xf32, #tpu.memory_space<any>> -> memref<1x128xf32, #tpu.memory_space<any>>
    %c3_i32_10 = arith.constant 3 : i32
    %c0_i32_11 = arith.constant 0 : i32
    %17 = tpu.memref_slice %arg5[%c3_i32_10, %c0_i32_11] : memref<8x128xf32, #tpu.memory_space<vmem>> -> memref<1x128xf32, #tpu.memory_space<vmem>>
    %18 = tpu.memref_slice %arg6[%c3_i32] : memref<8x!tpu.dma_semaphore, #tpu.memory_space<semaphore_mem>> -> memref<1x!tpu.dma_semaphore, #tpu.memory_space<semaphore_mem>>
    %19 = tpu.memref_squeeze %18 : memref<1x!tpu.dma_semaphore, #tpu.memory_space<semaphore_mem>> -> memref<!tpu.dma_semaphore, #tpu.memory_space<semaphore_mem>>
    tpu.enqueue_dma source(%16 : memref<1x128xf32, #tpu.memory_space<any>>) target(%17 : memref<1x128xf32, #tpu.memory_space<vmem>>) target_semaphore(%19 : memref<!tpu.dma_semaphore, #tpu.memory_space<semaphore_mem>>)
    %c4 = arith.constant 4 : index
    %20 = memref.load %arg0[%c4] : memref<8xi32, #tpu.memory_space<smem>>
    %c4_i32 = arith.constant 4 : i32
    %c0_i32_12 = arith.constant 0 : i32
    %21 = tpu.memref_slice %arg1[%20, %c0_i32_12] : memref<512x128xf32, #tpu.memory_space<any>> -> memref<1x128xf32, #tpu.memory_space<any>>
    %c4_i32_13 = arith.constant 4 : i32
    %c0_i32_14 = arith.constant 0 : i32
    %22 = tpu.memref_slice %arg5[%c4_i32_13, %c0_i32_14] : memref<8x128xf32, #tpu.memory_space<vmem>> -> memref<1x128xf32, #tpu.memory_space<vmem>>
    %23 = tpu.memref_slice %arg6[%c4_i32] : memref<8x!tpu.dma_semaphore, #tpu.memory_space<semaphore_mem>> -> memref<1x!tpu.dma_semaphore, #tpu.memory_space<semaphore_mem>>
    %24 = tpu.memref_squeeze %23 : memref<1x!tpu.dma_semaphore, #tpu.memory_space<semaphore_mem>> -> memref<!tpu.dma_semaphore, #tpu.memory_space<semaphore_mem>>
    tpu.enqueue_dma source(%21 : memref<1x128xf32, #tpu.memory_space<any>>) target(%22 : memref<1x128xf32, #tpu.memory_space<vmem>>) target_semaphore(%24 : memref<!tpu.dma_semaphore, #tpu.memory_space<semaphore_mem>>)
    %c5 = arith.constant 5 : index
    %25 = memref.load %arg0[%c5] : memref<8xi32, #tpu.memory_space<smem>>
    %c5_i32 = arith.constant 5 : i32
    %c0_i32_15 = arith.constant 0 : i32
    %26 = tpu.memref_slice %arg1[%25, %c0_i32_15] : memref<512x128xf32, #tpu.memory_space<any>> -> memref<1x128xf32, #tpu.memory_space<any>>
    %c5_i32_16 = arith.constant 5 : i32
    %c0_i32_17 = arith.constant 0 : i32
    %27 = tpu.memref_slice %arg5[%c5_i32_16, %c0_i32_17] : memref<8x128xf32, #tpu.memory_space<vmem>> -> memref<1x128xf32, #tpu.memory_space<vmem>>
    %28 = tpu.memref_slice %arg6[%c5_i32] : memref<8x!tpu.dma_semaphore, #tpu.memory_space<semaphore_mem>> -> memref<1x!tpu.dma_semaphore, #tpu.memory_space<semaphore_mem>>
    %29 = tpu.memref_squeeze %28 : memref<1x!tpu.dma_semaphore, #tpu.memory_space<semaphore_mem>> -> memref<!tpu.dma_semaphore, #tpu.memory_space<semaphore_mem>>
    tpu.enqueue_dma source(%26 : memref<1x128xf32, #tpu.memory_space<any>>) target(%27 : memref<1x128xf32, #tpu.memory_space<vmem>>) target_semaphore(%29 : memref<!tpu.dma_semaphore, #tpu.memory_space<semaphore_mem>>)
    %c6 = arith.constant 6 : index
    %30 = memref.load %arg0[%c6] : memref<8xi32, #tpu.memory_space<smem>>
    %c6_i32 = arith.constant 6 : i32
    %c0_i32_18 = arith.constant 0 : i32
    %31 = tpu.memref_slice %arg1[%30, %c0_i32_18] : memref<512x128xf32, #tpu.memory_space<any>> -> memref<1x128xf32, #tpu.memory_space<any>>
    %c6_i32_19 = arith.constant 6 : i32
    %c0_i32_20 = arith.constant 0 : i32
    %32 = tpu.memref_slice %arg5[%c6_i32_19, %c0_i32_20] : memref<8x128xf32, #tpu.memory_space<vmem>> -> memref<1x128xf32, #tpu.memory_space<vmem>>
    %33 = tpu.memref_slice %arg6[%c6_i32] : memref<8x!tpu.dma_semaphore, #tpu.memory_space<semaphore_mem>> -> memref<1x!tpu.dma_semaphore, #tpu.memory_space<semaphore_mem>>
    %34 = tpu.memref_squeeze %33 : memref<1x!tpu.dma_semaphore, #tpu.memory_space<semaphore_mem>> -> memref<!tpu.dma_semaphore, #tpu.memory_space<semaphore_mem>>
    tpu.enqueue_dma source(%31 : memref<1x128xf32, #tpu.memory_space<any>>) target(%32 : memref<1x128xf32, #tpu.memory_space<vmem>>) target_semaphore(%34 : memref<!tpu.dma_semaphore, #tpu.memory_space<semaphore_mem>>)
    %c7 = arith.constant 7 : index
    %35 = memref.load %arg0[%c7] : memref<8xi32, #tpu.memory_space<smem>>
    %c7_i32 = arith.constant 7 : i32
    %c0_i32_21 = arith.constant 0 : i32
    %36 = tpu.memref_slice %arg1[%35, %c0_i32_21] : memref<512x128xf32, #tpu.memory_space<any>> -> memref<1x128xf32, #tpu.memory_space<any>>
    %c7_i32_22 = arith.constant 7 : i32
    %c0_i32_23 = arith.constant 0 : i32
    %37 = tpu.memref_slice %arg5[%c7_i32_22, %c0_i32_23] : memref<8x128xf32, #tpu.memory_space<vmem>> -> memref<1x128xf32, #tpu.memory_space<vmem>>
    %38 = tpu.memref_slice %arg6[%c7_i32] : memref<8x!tpu.dma_semaphore, #tpu.memory_space<semaphore_mem>> -> memref<1x!tpu.dma_semaphore, #tpu.memory_space<semaphore_mem>>
    %39 = tpu.memref_squeeze %38 : memref<1x!tpu.dma_semaphore, #tpu.memory_space<semaphore_mem>> -> memref<!tpu.dma_semaphore, #tpu.memory_space<semaphore_mem>>
    tpu.enqueue_dma source(%36 : memref<1x128xf32, #tpu.memory_space<any>>) target(%37 : memref<1x128xf32, #tpu.memory_space<vmem>>) target_semaphore(%39 : memref<!tpu.dma_semaphore, #tpu.memory_space<semaphore_mem>>)
    %c0_i32_24 = arith.constant 0 : i32
    %c0_i32_25 = arith.constant 0 : i32
    %40 = tpu.memref_slice %arg1[%0, %c0_i32_25] : memref<512x128xf32, #tpu.memory_space<any>> -> memref<1x128xf32, #tpu.memory_space<any>>
    %c0_i32_26 = arith.constant 0 : i32
    %c0_i32_27 = arith.constant 0 : i32
    %41 = tpu.memref_slice %arg5[%c0_i32_26, %c0_i32_27] : memref<8x128xf32, #tpu.memory_space<vmem>> -> memref<1x128xf32, #tpu.memory_space<vmem>>
    %42 = tpu.memref_slice %arg6[%c0_i32_24] : memref<8x!tpu.dma_semaphore, #tpu.memory_space<semaphore_mem>> -> memref<1x!tpu.dma_semaphore, #tpu.memory_space<semaphore_mem>>
    %43 = tpu.memref_squeeze %42 : memref<1x!tpu.dma_semaphore, #tpu.memory_space<semaphore_mem>> -> memref<!tpu.dma_semaphore, #tpu.memory_space<semaphore_mem>>
    tpu.wait_dma2 semaphore(%43 : memref<!tpu.dma_semaphore, #tpu.memory_space<semaphore_mem>>) src(%40 : memref<1x128xf32, #tpu.memory_space<any>>) dst(%41 : memref<1x128xf32, #tpu.memory_space<vmem>>)
    %c1_i32_28 = arith.constant 1 : i32
    %c0_i32_29 = arith.constant 0 : i32
    %44 = tpu.memref_slice %arg1[%5, %c0_i32_29] : memref<512x128xf32, #tpu.memory_space<any>> -> memref<1x128xf32, #tpu.memory_space<any>>
    %c1_i32_30 = arith.constant 1 : i32
    %c0_i32_31 = arith.constant 0 : i32
    %45 = tpu.memref_slice %arg5[%c1_i32_30, %c0_i32_31] : memref<8x128xf32, #tpu.memory_space<vmem>> -> memref<1x128xf32, #tpu.memory_space<vmem>>
    %46 = tpu.memref_slice %arg6[%c1_i32_28] : memref<8x!tpu.dma_semaphore, #tpu.memory_space<semaphore_mem>> -> memref<1x!tpu.dma_semaphore, #tpu.memory_space<semaphore_mem>>
    %47 = tpu.memref_squeeze %46 : memref<1x!tpu.dma_semaphore, #tpu.memory_space<semaphore_mem>> -> memref<!tpu.dma_semaphore, #tpu.memory_space<semaphore_mem>>
    tpu.wait_dma2 semaphore(%47 : memref<!tpu.dma_semaphore, #tpu.memory_space<semaphore_mem>>) src(%44 : memref<1x128xf32, #tpu.memory_space<any>>) dst(%45 : memref<1x128xf32, #tpu.memory_space<vmem>>)
    %c2_i32_32 = arith.constant 2 : i32
    %c0_i32_33 = arith.constant 0 : i32
    %48 = tpu.memref_slice %arg1[%10, %c0_i32_33] : memref<512x128xf32, #tpu.memory_space<any>> -> memref<1x128xf32, #tpu.memory_space<any>>
    %c2_i32_34 = arith.constant 2 : i32
    %c0_i32_35 = arith.constant 0 : i32
    %49 = tpu.memref_slice %arg5[%c2_i32_34, %c0_i32_35] : memref<8x128xf32, #tpu.memory_space<vmem>> -> memref<1x128xf32, #tpu.memory_space<vmem>>
    %50 = tpu.memref_slice %arg6[%c2_i32_32] : memref<8x!tpu.dma_semaphore, #tpu.memory_space<semaphore_mem>> -> memref<1x!tpu.dma_semaphore, #tpu.memory_space<semaphore_mem>>
    %51 = tpu.memref_squeeze %50 : memref<1x!tpu.dma_semaphore, #tpu.memory_space<semaphore_mem>> -> memref<!tpu.dma_semaphore, #tpu.memory_space<semaphore_mem>>
    tpu.wait_dma2 semaphore(%51 : memref<!tpu.dma_semaphore, #tpu.memory_space<semaphore_mem>>) src(%48 : memref<1x128xf32, #tpu.memory_space<any>>) dst(%49 : memref<1x128xf32, #tpu.memory_space<vmem>>)
    %c3_i32_36 = arith.constant 3 : i32
    %c0_i32_37 = arith.constant 0 : i32
    %52 = tpu.memref_slice %arg1[%15, %c0_i32_37] : memref<512x128xf32, #tpu.memory_space<any>> -> memref<1x128xf32, #tpu.memory_space<any>>
    %c3_i32_38 = arith.constant 3 : i32
    %c0_i32_39 = arith.constant 0 : i32
    %53 = tpu.memref_slice %arg5[%c3_i32_38, %c0_i32_39] : memref<8x128xf32, #tpu.memory_space<vmem>> -> memref<1x128xf32, #tpu.memory_space<vmem>>
    %54 = tpu.memref_slice %arg6[%c3_i32_36] : memref<8x!tpu.dma_semaphore, #tpu.memory_space<semaphore_mem>> -> memref<1x!tpu.dma_semaphore, #tpu.memory_space<semaphore_mem>>
    %55 = tpu.memref_squeeze %54 : memref<1x!tpu.dma_semaphore, #tpu.memory_space<semaphore_mem>> -> memref<!tpu.dma_semaphore, #tpu.memory_space<semaphore_mem>>
    tpu.wait_dma2 semaphore(%55 : memref<!tpu.dma_semaphore, #tpu.memory_space<semaphore_mem>>) src(%52 : memref<1x128xf32, #tpu.memory_space<any>>) dst(%53 : memref<1x128xf32, #tpu.memory_space<vmem>>)
    %c4_i32_40 = arith.constant 4 : i32
    %c0_i32_41 = arith.constant 0 : i32
    %56 = tpu.memref_slice %arg1[%20, %c0_i32_41] : memref<512x128xf32, #tpu.memory_space<any>> -> memref<1x128xf32, #tpu.memory_space<any>>
    %c4_i32_42 = arith.constant 4 : i32
    %c0_i32_43 = arith.constant 0 : i32
    %57 = tpu.memref_slice %arg5[%c4_i32_42, %c0_i32_43] : memref<8x128xf32, #tpu.memory_space<vmem>> -> memref<1x128xf32, #tpu.memory_space<vmem>>
    %58 = tpu.memref_slice %arg6[%c4_i32_40] : memref<8x!tpu.dma_semaphore, #tpu.memory_space<semaphore_mem>> -> memref<1x!tpu.dma_semaphore, #tpu.memory_space<semaphore_mem>>
    %59 = tpu.memref_squeeze %58 : memref<1x!tpu.dma_semaphore, #tpu.memory_space<semaphore_mem>> -> memref<!tpu.dma_semaphore, #tpu.memory_space<semaphore_mem>>
    tpu.wait_dma2 semaphore(%59 : memref<!tpu.dma_semaphore, #tpu.memory_space<semaphore_mem>>) src(%56 : memref<1x128xf32, #tpu.memory_space<any>>) dst(%57 : memref<1x128xf32, #tpu.memory_space<vmem>>)
    %c5_i32_44 = arith.constant 5 : i32
    %c0_i32_45 = arith.constant 0 : i32
    %60 = tpu.memref_slice %arg1[%25, %c0_i32_45] : memref<512x128xf32, #tpu.memory_space<any>> -> memref<1x128xf32, #tpu.memory_space<any>>
    %c5_i32_46 = arith.constant 5 : i32
    %c0_i32_47 = arith.constant 0 : i32
    %61 = tpu.memref_slice %arg5[%c5_i32_46, %c0_i32_47] : memref<8x128xf32, #tpu.memory_space<vmem>> -> memref<1x128xf32, #tpu.memory_space<vmem>>
    %62 = tpu.memref_slice %arg6[%c5_i32_44] : memref<8x!tpu.dma_semaphore, #tpu.memory_space<semaphore_mem>> -> memref<1x!tpu.dma_semaphore, #tpu.memory_space<semaphore_mem>>
    %63 = tpu.memref_squeeze %62 : memref<1x!tpu.dma_semaphore, #tpu.memory_space<semaphore_mem>> -> memref<!tpu.dma_semaphore, #tpu.memory_space<semaphore_mem>>
    tpu.wait_dma2 semaphore(%63 : memref<!tpu.dma_semaphore, #tpu.memory_space<semaphore_mem>>) src(%60 : memref<1x128xf32, #tpu.memory_space<any>>) dst(%61 : memref<1x128xf32, #tpu.memory_space<vmem>>)
    %c6_i32_48 = arith.constant 6 : i32
    %c0_i32_49 = arith.constant 0 : i32
    %64 = tpu.memref_slice %arg1[%30, %c0_i32_49] : memref<512x128xf32, #tpu.memory_space<any>> -> memref<1x128xf32, #tpu.memory_space<any>>
    %c6_i32_50 = arith.constant 6 : i32
    %c0_i32_51 = arith.constant 0 : i32
    %65 = tpu.memref_slice %arg5[%c6_i32_50, %c0_i32_51] : memref<8x128xf32, #tpu.memory_space<vmem>> -> memref<1x128xf32, #tpu.memory_space<vmem>>
    %66 = tpu.memref_slice %arg6[%c6_i32_48] : memref<8x!tpu.dma_semaphore, #tpu.memory_space<semaphore_mem>> -> memref<1x!tpu.dma_semaphore, #tpu.memory_space<semaphore_mem>>
    %67 = tpu.memref_squeeze %66 : memref<1x!tpu.dma_semaphore, #tpu.memory_space<semaphore_mem>> -> memref<!tpu.dma_semaphore, #tpu.memory_space<semaphore_mem>>
    tpu.wait_dma2 semaphore(%67 : memref<!tpu.dma_semaphore, #tpu.memory_space<semaphore_mem>>) src(%64 : memref<1x128xf32, #tpu.memory_space<any>>) dst(%65 : memref<1x128xf32, #tpu.memory_space<vmem>>)
    %c7_i32_52 = arith.constant 7 : i32
    %c0_i32_53 = arith.constant 0 : i32
    %68 = tpu.memref_slice %arg1[%35, %c0_i32_53] : memref<512x128xf32, #tpu.memory_space<any>> -> memref<1x128xf32, #tpu.memory_space<any>>
    %c7_i32_54 = arith.constant 7 : i32
    %c0_i32_55 = arith.constant 0 : i32
    %69 = tpu.memref_slice %arg5[%c7_i32_54, %c0_i32_55] : memref<8x128xf32, #tpu.memory_space<vmem>> -> memref<1x128xf32, #tpu.memory_space<vmem>>
    %70 = tpu.memref_slice %arg6[%c7_i32_52] : memref<8x!tpu.dma_semaphore, #tpu.memory_space<semaphore_mem>> -> memref<1x!tpu.dma_semaphore, #tpu.memory_space<semaphore_mem>>
    %71 = tpu.memref_squeeze %70 : memref<1x!tpu.dma_semaphore, #tpu.memory_space<semaphore_mem>> -> memref<!tpu.dma_semaphore, #tpu.memory_space<semaphore_mem>>
    tpu.wait_dma2 semaphore(%71 : memref<!tpu.dma_semaphore, #tpu.memory_space<semaphore_mem>>) src(%68 : memref<1x128xf32, #tpu.memory_space<any>>) dst(%69 : memref<1x128xf32, #tpu.memory_space<vmem>>)
    %c0_56 = arith.constant 0 : index
    %c0_57 = arith.constant 0 : index
    %72 = vector.load %arg5[%c0_56, %c0_57] : memref<8x128xf32, #tpu.memory_space<vmem>>, vector<8x128xf32>
    %cst = arith.constant dense<0.000000e+00> : vector<128xf32>
    %73 = vector.multi_reduction <add>, %72, %cst [0] : vector<8x128xf32> to vector<128xf32>
    %74 = vector.shape_cast %73 : vector<128xf32> to vector<1x128xf32>
    %75 = arith.truncf %74 : vector<1x128xf32> to vector<1x128xbf16>
    %c0_58 = arith.constant 0 : index
    %c0_59 = arith.constant 0 : index
    %76 = vector.load %arg2[%c0_58, %c0_59] : memref<128x512xbf16, #tpu.memory_space<vmem>>, vector<128x512xbf16>
    %cst_60 = arith.constant dense<0.000000e+00> : vector<1x512xf32>
    %77 = tpu.matmul %75, %76, %cst_60 {dimension_numbers = #tpu.dot_dimension_numbers<[1], [0], [0], [1], [0, 0, 1, 1], [], []>} : vector<1x128xbf16>, vector<128x512xbf16>, vector<1x512xf32> -> vector<1x512xf32>
    %c0_61 = arith.constant 0 : index
    %c0_62 = arith.constant 0 : index
    %78 = vector.load %arg3[%c0_61, %c0_62] : memref<1x512xf32, #tpu.memory_space<vmem>>, vector<1x512xf32>
    %79 = arith.addf %77, %78 : vector<1x512xf32>
    %cst_63 = arith.constant dense<0xFF800000> : vector<1xf32>
    %80 = vector.multi_reduction <maximumf>, %79, %cst_63 [1] : vector<1x512xf32> to vector<1xf32>
    %81 = vector.shape_cast %80 : vector<1xf32> to vector<1x1xf32>
    %82 = vector.broadcast %81 : vector<1x1xf32> to vector<1x512xf32>
    %83 = arith.subf %79, %82 : vector<1x512xf32>
    %84 = math.exp %83 : vector<1x512xf32>
    %cst_64 = arith.constant dense<0.000000e+00> : vector<1xf32>
    %85 = vector.multi_reduction <add>, %84, %cst_64 [1] : vector<1x512xf32> to vector<1xf32>
    %86 = vector.shape_cast %85 : vector<1xf32> to vector<1x1xf32>
    %87 = math.log %86 : vector<1x1xf32>
    %88 = vector.broadcast %87 : vector<1x1xf32> to vector<1x512xf32>
    %89 = arith.subf %83, %88 : vector<1x512xf32>
    %c0_65 = arith.constant 0 : index
    %c0_66 = arith.constant 0 : index
    %90 = vector.load %arg4[%c0_65, %c0_66] : memref<1x512xf32, #tpu.memory_space<vmem>>, vector<1x512xf32>
    tpu.vector_store %arg4[%c0_65, %c0_66], %89 {strides = array<i32>} : memref<1x512xf32, #tpu.memory_space<vmem>>, vector<1x512xf32>,
    return
  }
}

</mosaic_0001>

<bundles_post_ra>
// kernel: tpu_custom_call.1
= control target key start
LH: loop header
LB: loop body
LE: loop exit
PB: predicated region body
PF: predicated region fallthrough
CT: control target
= control target key end

     0   :  { %9 = vsyncpa [#allocation7], 0  ;;  %s1267_s0 = inlined_call_operand.hbm [shape: s32[8], index: 0, kind: input, shape index: {}]   ;;  %s1268_s1 = inlined_call_operand.hbm [shape: f32[512,128], index: 1, kind: input, shape index: {}]   ;;  %s1269_s2 = inlined_call_operand.hbm [shape: bf16[128,512], index: 2, kind: input, shape index: {}]   ;;  %s1270_s3 = inlined_call_operand.vmem [shape: f32[1,512], index: 3, kind: input, shape index: {}]   ;;  %s1271_s4 = inlined_call_operand.hbm [shape: f32[1,512], index: 4, kind: output, shape index: {}]  }
   0x1   :  { %10 = vsyncpa [#allocation5], 0 }
   0x2   :  { %11 = vsyncpa [#allocation6], 0  ;;  %s775_s17 = scalar_lea.hbm %s1267_s0, 16 }
   0x3   :  { %p776_p0 = scmp.ne.s32.totalorder %s1267_s0, %s775_s17  ;;  %p779_p1 = scmp.lt.u32.totalorder %s775_s17, %s1267_s0 }
   0x5   :  { %p781_p2 = pnand %p779_p1, %p776_p0 }
   0x7   :  { %784 = shalt.err (!%p781_p2)
}
   0x8   :  { %s1043_s22 = smov [#allocation4]   ;;  %s1044_s25 = smov [#allocation8]  }
   0x9   :  { %19 = dma.hbm_to_smem %s1267_s0, 16, %s1043_s22, [#allocation7]  }
   0xa   :  { %s25_s26 = sshll.u32 %s1044_s25, 4  ;;  %s785_s29 = scalar_lea.hbm %s1269_s2, 4096  ;;  %s26_s26 = int_to_ptr.vmem [resolvable:$true] %s25_s26 }
   0xb   :  { %p786_p3 = scmp.ne.s32.totalorder %s1269_s2, %s785_s29  ;;  %p789_p4 = scmp.lt.u32.totalorder %s785_s29, %s1269_s2 }
   0xd   :  { %p791_p5 = pnand %p789_p4, %p786_p3 }
   0xf   :  { %794 = shalt.err (!%p791_p5)
}
  0x10   :  { %s795_s8 = scalar_lea.vmem %s26_s26, 4096  ;;  %p800_p7 = scmp.lt.s32.totalorder %s26_s26, %s26_s26 }
  0x11   :  { %p796_p6 = scmp.ne.s32.totalorder %s26_s26, %s795_s8  ;;  %p801_p8 = scmp.lt.s32.totalorder %s795_s8, %s795_s8 }
  0x13   :  { %p802_p9 = por %p801_p8, %p800_p7 }
  0x15   :  { %p803_p10 = pnand %p802_p9, %p796_p6 }
  0x17   :  { %806 = shalt.err (!%p803_p10)
}
  0x18   :  { %s1045_s0 = smov 256   ;;  %s1046_s9 = smov 16  }
  0x19   :  { %31 = dma.hbm_to_vmem [thread:$0]  %s1269_s2, 4096, %s26_s26, [#allocation5], %s1045_s0, %s1045_s0, %s1046_s9  }
  0x1a   :  { %1021 = dma.done.wait [#allocation7], 16  }
  0x1b   :  { %1022 = vsyncadd [#allocation7], 4294967280 }
  0x1c   :  { %1023 = dma.done.wait [#allocation5], 4096  }
  0x1d   :  { %1024 = vsyncadd [#allocation5], 4294963200 }
  0x1e   :  { %40 = sfence }
  0x1f   :  { %s42_s12 = sld [smem:[#allocation4]]  ;;  %s1047_s13 = smov [#allocation2]  }
  0x20   :  { %s52_s14 = sshll.u32 %s1047_s13, 4  ;;  %s1107_s15 = sld [smem:[#allocation4 + $0x1]]  ;;  %s1109_s14 = int_to_ptr.vmem [resolvable:$true] %s52_s14 }
  0x21   :  { %s1048_s16 = smov [#allocation2 + $0x1]   ;;  %s1111_s18 = sld [smem:[#allocation4 + $0x2]] }
  0x22   :  { %s68_s17 = sshll.u32 %s1048_s16, 4  ;;  %s1049_s2 = smov [#allocation2 + $0x2]   ;;  %s1113_s17 = int_to_ptr.vmem [resolvable:$true] %s68_s17 }
  0x23   :  { %s84_s19 = sshll.u32 %s1049_s2, 4  ;;  %s1115_s20 = sld [smem:[#allocation4 + $0x3]]  ;;  %s1117_s19 = int_to_ptr.vmem [resolvable:$true] %s84_s19 }
  0x24   :  { %s1126_s29 = scalar_lea.hbm %s1268_s1, 8192 }
  0x25   :  { %s647_s21 = sshll.u32 %s42_s12, 4 }
  0x26   :  { %s44_s24 = scalar_lea.hbm %s1268_s1, %s647_s21  ;;  %s649_s25 = sshll.u32 %s1107_s15, 4 }
  0x27   :  { %s807_s26 = scalar_lea.hbm %s44_s24, 16  ;;  %p810_p12 = scmp.lt.u32.totalorder %s44_s24, %s1268_s1 }
  0x28   :  { %p808_p11 = scmp.ne.s32.totalorder %s44_s24, %s807_s26  ;;  %p811_p13 = scmp.lt.u32.totalorder %s1126_s29, %s807_s26 }
  0x29   :  { %p813_p1 = scmp.lt.u32.totalorder %s807_s26, %s44_s24 }
  0x2a   :  { %p812_p0 = por %p811_p13, %p810_p12 }
  0x2c   :  { %p814_p2 = por %p813_p1, %p812_p0 }
  0x2e   :  { %p815_p3 = pnand %p814_p2, %p808_p11 }
  0x30   :  { %818 = shalt.err (!%p815_p3)  }
  0x31   :  { %s819_s6 = scalar_lea.vmem %s1109_s14, 16  ;;  %s1135_s7 = scalar_lea.vmem %s1109_s14, 128 }
  0x32   :  { %p820_p4 = scmp.ne.s32.totalorder %s1109_s14, %s819_s6  ;;  %p824_p5 = scmp.lt.s32.totalorder %s1109_s14, %s1109_s14 }
  0x33   :  { %p825_p6 = scmp.lt.s32.totalorder %s1135_s7, %s819_s6 }
  0x35   :  { %p826_p7 = por %p825_p6, %p824_p5 }
  0x37   :  { %p827_p8 = pnand %p826_p7, %p820_p4 }
  0x39   :  { %830 = shalt.err (!%p827_p8)  }
  0x3a   :  { %55 = dma.hbm_to_vmem [thread:$0]  %s44_s24, 16, %s1109_s14, [#allocation3] }
  0x3b   :  { %s58_s9 = scalar_lea.hbm %s1268_s1, %s649_s25  ;;  %s651_s10 = sshll.u32 %s1111_s18, 4 }
  0x3c   :  { %s831_s11 = scalar_lea.hbm %s58_s9, 16  ;;  %p834_p10 = scmp.lt.u32.totalorder %s58_s9, %s1268_s1 }
  0x3d   :  { %p832_p9 = scmp.ne.s32.totalorder %s58_s9, %s831_s11  ;;  %p835_p11 = scmp.lt.u32.totalorder %s1126_s29, %s831_s11 }
  0x3e   :  { %p837_p13 = scmp.lt.u32.totalorder %s831_s11, %s58_s9 }
  0x3f   :  { %p836_p12 = por %p835_p11, %p834_p10 }
  0x41   :  { %p838_p0 = por %p837_p13, %p836_p12 }
  0x43   :  { %p839_p1 = pnand %p838_p0, %p832_p9 }
  0x45   :  { %842 = shalt.err (!%p839_p1)  }
  0x46   :  { %s843_s15 = scalar_lea.vmem %s1113_s17, 16  ;;  %p848_p3 = scmp.lt.s32.totalorder %s1113_s17, %s1109_s14 }
  0x47   :  { %p844_p2 = scmp.ne.s32.totalorder %s1113_s17, %s843_s15  ;;  %p849_p4 = scmp.lt.s32.totalorder %s1135_s7, %s843_s15 }
  0x49   :  { %p850_p5 = por %p849_p4, %p848_p3 }
  0x4b   :  { %p851_p6 = pnand %p850_p5, %p844_p2 }
  0x4d   :  { %854 = shalt.err (!%p851_p6)  }
  0x4e   :  { %71 = dma.hbm_to_vmem [thread:$0]  %s58_s9, 16, %s1113_s17, [#allocation3 + $0x1] }
  0x4f   :  { %s74_s2 = scalar_lea.hbm %s1268_s1, %s651_s10  ;;  %s653_s21 = sshll.u32 %s1115_s20, 4 }
  0x50   :  { %s855_s22 = scalar_lea.hbm %s74_s2, 16  ;;  %p858_p8 = scmp.lt.u32.totalorder %s74_s2, %s1268_s1 }
  0x51   :  { %p856_p7 = scmp.ne.s32.totalorder %s74_s2, %s855_s22  ;;  %p859_p9 = scmp.lt.u32.totalorder %s1126_s29, %s855_s22 }
  0x52   :  { %p861_p11 = scmp.lt.u32.totalorder %s855_s22, %s74_s2 }
  0x53   :  { %p860_p10 = por %p859_p9, %p858_p8 }
  0x55   :  { %p862_p12 = por %p861_p11, %p860_p10 }
  0x57   :  { %p863_p13 = pnand %p862_p12, %p856_p7 }
  0x59   :  { %866 = shalt.err (!%p863_p13)  }
  0x5a   :  { %s867_s17 = scalar_lea.vmem %s1117_s19, 16  ;;  %p872_p1 = scmp.lt.s32.totalorder %s1117_s19, %s1109_s14 }
  0x5b   :  { %p868_p0 = scmp.ne.s32.totalorder %s1117_s19, %s867_s17  ;;  %p873_p2 = scmp.lt.s32.totalorder %s1135_s7, %s867_s17 }
  0x5d   :  { %p874_p3 = por %p873_p2, %p872_p1 }
  0x5f   :  { %p875_p4 = pnand %p874_p3, %p868_p0 }
  0x61   :  { %878 = shalt.err (!%p875_p4)  }
  0x62   :  { %87 = dma.hbm_to_vmem [thread:$0]  %s74_s2, 16, %s1117_s19, [#allocation3 + $0x2] }
  0x63   :  { %s90_s26 = scalar_lea.hbm %s1268_s1, %s653_s21  ;;  %s1050_s27 = smov [#allocation2 + $0x3]  }
  0x64   :  { %s100_s28 = sshll.u32 %s1050_s27, 4  ;;  %s1172_s30 = sld [smem:[#allocation4 + $0x4]]  ;;  %s101_s28 = int_to_ptr.vmem [resolvable:$true] %s100_s28 }
  0x65   :  { %s879_s5 = scalar_lea.hbm %s90_s26, 16  ;;  %p882_p6 = scmp.lt.u32.totalorder %s90_s26, %s1268_s1 }
  0x66   :  { %p880_p5 = scmp.ne.s32.totalorder %s90_s26, %s879_s5  ;;  %p883_p7 = scmp.lt.u32.totalorder %s1126_s29, %s879_s5 }
  0x67   :  { %p885_p9 = scmp.lt.u32.totalorder %s879_s5, %s90_s26 }
  0x68   :  { %p884_p8 = por %p883_p7, %p882_p6 }
  0x6a   :  { %p886_p10 = por %p885_p9, %p884_p8 }
  0x6c   :  { %p887_p11 = pnand %p886_p10, %p880_p5 }
  0x6e   :  { %890 = shalt.err (!%p887_p11)  }
  0x6f   :  { %s891_s19 = scalar_lea.vmem %s101_s28, 16  ;;  %p896_p13 = scmp.lt.s32.totalorder %s101_s28, %s1109_s14 }
  0x70   :  { %p892_p12 = scmp.ne.s32.totalorder %s101_s28, %s891_s19  ;;  %p897_p0 = scmp.lt.s32.totalorder %s1135_s7, %s891_s19 }
  0x72   :  { %p898_p1 = por %p897_p0, %p896_p13 }
  0x74   :  { %p899_p2 = pnand %p898_p1, %p892_p12 }
  0x76   :  { %902 = shalt.err (!%p899_p2)  }
  0x77   :  { %103 = dma.hbm_to_vmem [thread:$0]  %s90_s26, 16, %s101_s28, [#allocation3 + $0x3] }
  0x78   :  { %s1051_s0 = smov [#allocation2 + $0x4]   ;;  %s1180_s10 = sld [smem:[#allocation4 + $0x5]] }
  0x79   :  { %s116_s9 = sshll.u32 %s1051_s0, 4  ;;  %s1052_s11 = smov [#allocation2 + $0x5]   ;;  %s117_s9 = int_to_ptr.vmem [resolvable:$true] %s116_s9 }
  0x7a   :  { %s132_s12 = sshll.u32 %s1052_s11, 4  ;;  %s1182_s13 = sld [smem:[#allocation4 + $0x6]]  ;;  %s1185_s12 = int_to_ptr.vmem [resolvable:$true] %s132_s12 }
  0x7b   :  { %s655_s15 = sshll.u32 %s1172_s30, 4 }
  0x7c   :  { %s106_s2 = scalar_lea.hbm %s1268_s1, %s655_s15 }
  0x7d   :  { %s903_s21 = scalar_lea.hbm %s106_s2, 16  ;;  %p906_p4 = scmp.lt.u32.totalorder %s106_s2, %s1268_s1 }
  0x7e   :  { %p904_p3 = scmp.ne.s32.totalorder %s106_s2, %s903_s21  ;;  %p907_p5 = scmp.lt.u32.totalorder %s1126_s29, %s903_s21 }
  0x7f   :  { %p909_p7 = scmp.lt.u32.totalorder %s903_s21, %s106_s2 }
  0x80   :  { %p908_p6 = por %p907_p5, %p906_p4 }
  0x82   :  { %p910_p8 = por %p909_p7, %p908_p6 }
  0x84   :  { %p911_p9 = pnand %p910_p8, %p904_p3 }
  0x86   :  { %914 = shalt.err (!%p911_p9)  }
  0x87   :  { %s915_s24 = scalar_lea.vmem %s117_s9, 16  ;;  %p920_p11 = scmp.lt.s32.totalorder %s117_s9, %s1109_s14 }
  0x88   :  { %p916_p10 = scmp.ne.s32.totalorder %s117_s9, %s915_s24  ;;  %p921_p12 = scmp.lt.s32.totalorder %s1135_s7, %s915_s24 }
  0x8a   :  { %p922_p13 = por %p921_p12, %p920_p11 }
  0x8c   :  { %p923_p0 = pnand %p922_p13, %p916_p10 }
  0x8e   :  { %926 = shalt.err (!%p923_p0)  }
  0x8f   :  { %119 = dma.hbm_to_vmem [thread:$0]  %s106_s2, 16, %s117_s9, [#allocation3 + $0x4] }
  0x90   :  { %s657_s17 = sshll.u32 %s1180_s10, 4  ;;  %s1053_s20 = smov [#allocation2 + $0x6]  }
  0x91   :  { %s148_s25 = sshll.u32 %s1053_s20, 4  ;;  %s122_s28 = scalar_lea.hbm %s1268_s1, %s657_s17  ;;  %s1200_s25 = int_to_ptr.vmem [resolvable:$true] %s148_s25 }
  0x92   :  { %s927_s30 = scalar_lea.hbm %s122_s28, 16  ;;  %p930_p2 = scmp.lt.u32.totalorder %s122_s28, %s1268_s1 }
  0x93   :  { %p928_p1 = scmp.ne.s32.totalorder %s122_s28, %s927_s30  ;;  %p931_p3 = scmp.lt.u32.totalorder %s1126_s29, %s927_s30 }
  0x94   :  { %p933_p5 = scmp.lt.u32.totalorder %s927_s30, %s122_s28 }
  0x95   :  { %p932_p4 = por %p931_p3, %p930_p2 }
  0x97   :  { %p934_p6 = por %p933_p5, %p932_p4 }
  0x99   :  { %p935_p7 = pnand %p934_p6, %p928_p1 }
  0x9b   :  { %938 = shalt.err (!%p935_p7)  }
  0x9c   :  { %s939_s8 = scalar_lea.vmem %s1185_s12, 16  ;;  %p944_p9 = scmp.lt.s32.totalorder %s1185_s12, %s1109_s14 }
  0x9d   :  { %p940_p8 = scmp.ne.s32.totalorder %s1185_s12, %s939_s8  ;;  %p945_p10 = scmp.lt.s32.totalorder %s1135_s7, %s939_s8 }
  0x9f   :  { %p946_p11 = por %p945_p10, %p944_p9 }
  0xa1   :  { %p947_p12 = pnand %p946_p11, %p940_p8 }
  0xa3   :  { %950 = shalt.err (!%p947_p12)  }
  0xa4   :  { %135 = dma.hbm_to_vmem [thread:$0]  %s122_s28, 16, %s1185_s12, [#allocation3 + $0x5] }
  0xa5   :  { %s659_s19 = sshll.u32 %s1182_s13, 4  ;;  %s660_s0 = sld [smem:[#allocation4 + $0x7]] }
  0xa6   :  { %s138_s11 = scalar_lea.hbm %s1268_s1, %s659_s19 }
  0xa7   :  { %s951_s15 = scalar_lea.hbm %s138_s11, 16  ;;  %p954_p0 = scmp.lt.u32.totalorder %s138_s11, %s1268_s1 }
  0xa8   :  { %p952_p13 = scmp.ne.s32.totalorder %s138_s11, %s951_s15  ;;  %p955_p1 = scmp.lt.u32.totalorder %s1126_s29, %s951_s15 }
  0xa9   :  { %p957_p3 = scmp.lt.u32.totalorder %s951_s15, %s138_s11 }
  0xaa   :  { %p956_p2 = por %p955_p1, %p954_p0 }
  0xac   :  { %p958_p4 = por %p957_p3, %p956_p2 }
  0xae   :  { %p959_p5 = pnand %p958_p4, %p952_p13 }
  0xb0   :  { %962 = shalt.err (!%p959_p5)  }
  0xb1   :  { %s963_s12 = scalar_lea.vmem %s1200_s25, 16  ;;  %p968_p7 = scmp.lt.s32.totalorder %s1200_s25, %s1109_s14 }
  0xb2   :  { %p964_p6 = scmp.ne.s32.totalorder %s1200_s25, %s963_s12  ;;  %p969_p8 = scmp.lt.s32.totalorder %s1135_s7, %s963_s12 }
  0xb4   :  { %p970_p9 = por %p969_p8, %p968_p7 }
  0xb6   :  { %p971_p10 = pnand %p970_p9, %p964_p6 }
  0xb8   :  { %974 = shalt.err (!%p971_p10)  }
  0xb9   :  { %151 = dma.hbm_to_vmem [thread:$0]  %s138_s11, 16, %s1200_s25, [#allocation3 + $0x6] }
  0xba   :  { %s1054_s13 = smov [#allocation2 + $0x7]   ;;  %s661_s21 = sshll.u32 %s660_s0, 4 }
  0xbb   :  { %s164_s2 = sshll.u32 %s1054_s13, 4  ;;  %s154_s24 = scalar_lea.hbm %s1268_s1, %s661_s21  ;;  %s165_s2 = int_to_ptr.vmem [resolvable:$true] %s164_s2 }
  0xbc   :  { %s975_s17 = scalar_lea.hbm %s154_s24, 16  ;;  %p978_p12 = scmp.lt.u32.totalorder %s154_s24, %s1268_s1 }
  0xbd   :  { %p976_p11 = scmp.ne.s32.totalorder %s154_s24, %s975_s17  ;;  %p979_p13 = scmp.lt.u32.totalorder %s1126_s29, %s975_s17 }
  0xbe   :  { %p981_p1 = scmp.lt.u32.totalorder %s975_s17, %s154_s24 }
  0xbf   :  { %p980_p0 = por %p979_p13, %p978_p12 }
  0xc1   :  { %p982_p2 = por %p981_p1, %p980_p0 }
  0xc3   :  { %p983_p3 = pnand %p982_p2, %p976_p11 }
  0xc5   :  { %986 = shalt.err (!%p983_p3)  }
  0xc6   :  { %s987_s25 = scalar_lea.vmem %s165_s2, 16  ;;  %p992_p5 = scmp.lt.s32.totalorder %s165_s2, %s1109_s14 }
  0xc7   :  { %p988_p4 = scmp.ne.s32.totalorder %s165_s2, %s987_s25  ;;  %p993_p6 = scmp.lt.s32.totalorder %s1135_s7, %s987_s25 }
  0xc9   :  { %p994_p7 = por %p993_p6, %p992_p5 }
  0xcb   :  { %p995_p8 = pnand %p994_p7, %p988_p4 }
  0xcd   :  { %998 = shalt.err (!%p995_p8)  }
  0xce   :  { %167 = dma.hbm_to_vmem [thread:$0]  %s154_s24, 16, %s165_s2, [#allocation3 + $0x7] }
  0xcf   :  { %1025 = dma.done.wait [#allocation3], 16 }
  0xd0   :  { %1026 = vsyncadd [#allocation3], 4294967280 }
  0xd1   :  { %1027 = dma.done.wait [#allocation3 + $0x1], 16 }
  0xd2   :  { %1028 = vsyncadd [#allocation3 + $0x1], 4294967280 }
  0xd3   :  { %1029 = dma.done.wait [#allocation3 + $0x2], 16 }
  0xd4   :  { %1030 = vsyncadd [#allocation3 + $0x2], 4294967280 }
  0xd5   :  { %1031 = dma.done.wait [#allocation3 + $0x3], 16 }
  0xd6   :  { %1032 = vsyncadd [#allocation3 + $0x3], 4294967280 }
  0xd7   :  { %1033 = dma.done.wait [#allocation3 + $0x4], 16 }
  0xd8   :  { %1034 = vsyncadd [#allocation3 + $0x4], 4294967280 }
  0xd9   :  { %1035 = dma.done.wait [#allocation3 + $0x5], 16 }
  0xda   :  { %1036 = vsyncadd [#allocation3 + $0x5], 4294967280 }
  0xdb   :  { %1037 = dma.done.wait [#allocation3 + $0x6], 16 }
  0xdc   :  { %1038 = vsyncadd [#allocation3 + $0x6], 4294967280 }
  0xdd   :  { %1039 = dma.done.wait [#allocation3 + $0x7], 16 }
  0xde   :  { %1040 = vsyncadd [#allocation3 + $0x7], 4294967280  ;;  %v1055_v0 = vmov 0   ;;  %v717_v1 = vld [vmem:[#allocation8 + $0x4] ss:$16 sps:$4 sm:$0xff]   ;;  %v185_v27 = vld [vmem:[#allocation2] sm:$0xff]  ;;  %v387_v41 = vlaneseq }
  0xdf   :  { %439 = vmatprep.mubr.bf16.mxu0 %v1055_v0  ;;  %480 = vmatprep.mubr.bf16.mxu1 %v1055_v0  ;;  %v719_v2 = vld [vmem:[#allocation8 + $0xc] ss:$16 sps:$4 sm:$0xff]   ;;  %v721_v3 = vld [vmem:[#allocation8] ss:$16 sps:$4 sm:$0xff]   ;;  %v722_v4 = vld [vmem:[#allocation8 + $0x8] ss:$16 sps:$4 sm:$0xff]  }
  0xe0   :  { %407 = vmatprep.subr.bf16.mxu0 %v717_v1  ;;  %448 = vmatprep.subr.bf16.mxu1 %v719_v2  ;;  %v723_v5 = vld [vmem:[#allocation8 + $0x24] ss:$16 sps:$4 sm:$0xff]   ;;  %v725_v6 = vld [vmem:[#allocation8 + $0x2c] ss:$16 sps:$4 sm:$0xff]   ;;  %v727_v7 = vld [vmem:[#allocation8 + $0x20] ss:$16 sps:$4 sm:$0xff]  }
  0xe1   :  { %408 = vmatpush1.bf16.msra.mxu0 %v721_v3  ;;  %449 = vmatpush1.bf16.msra.mxu1 %v722_v4  ;;  %v728_v8 = vld [vmem:[#allocation8 + $0x28] ss:$16 sps:$4 sm:$0xff]   ;;  %v729_v9 = vld [vmem:[#allocation8 + $0x44] ss:$16 sps:$4 sm:$0xff]   ;;  %v731_v10 = vld [vmem:[#allocation8 + $0x4c] ss:$16 sps:$4 sm:$0xff]  }
  0xe2   :  { %409 = vmatprep.subr.bf16.mxu0 %v723_v5  ;;  %450 = vmatprep.subr.bf16.mxu1 %v725_v6  ;;  %v733_v11 = vld [vmem:[#allocation8 + $0x40] ss:$16 sps:$4 sm:$0xff]   ;;  %v734_v12 = vld [vmem:[#allocation8 + $0x48] ss:$16 sps:$4 sm:$0xff]   ;;  %v735_v13 = vld [vmem:[#allocation8 + $0x64] ss:$16 sps:$4 sm:$0xff]  }
  0xe3   :  { %v737_v14 = vld [vmem:[#allocation8 + $0x6c] ss:$16 sps:$4 sm:$0xff]   ;;  %v739_v15 = vld [vmem:[#allocation8 + $0x60] ss:$16 sps:$4 sm:$0xff]   ;;  %v740_v16 = vld [vmem:[#allocation8 + $0x68] ss:$16 sps:$4 sm:$0xff]  }
  0xe4   :  { %v741_v17 = vld [vmem:[#allocation8 + $0x84] ss:$16 sps:$4 sm:$0xff]   ;;  %v743_v18 = vld [vmem:[#allocation8 + $0x8c] ss:$16 sps:$4 sm:$0xff]   ;;  %v745_v19 = vld [vmem:[#allocation8 + $0x80] ss:$16 sps:$4 sm:$0xff]  }
  0xe5   :  { %410 = vmatpush1.bf16.msra.mxu0 %v727_v7  ;;  %451 = vmatpush1.bf16.msra.mxu1 %v728_v8  ;;  %v746_v20 = vld [vmem:[#allocation8 + $0x88] ss:$16 sps:$4 sm:$0xff]   ;;  %v747_v21 = vld [vmem:[#allocation8 + $0xa4] ss:$16 sps:$4 sm:$0xff]   ;;  %v749_v22 = vld [vmem:[#allocation8 + $0xac] ss:$16 sps:$4 sm:$0xff]  }
  0xe6   :  { %411 = vmatprep.subr.bf16.mxu0 %v729_v9  ;;  %452 = vmatprep.subr.bf16.mxu1 %v731_v10  ;;  %v751_v23 = vld [vmem:[#allocation8 + $0xa0] ss:$16 sps:$4 sm:$0xff]   ;;  %v752_v24 = vld [vmem:[#allocation8 + $0xa8] ss:$16 sps:$4 sm:$0xff]   ;;  %v753_v25 = vld [vmem:[#allocation8 + $0xc4] ss:$16 sps:$4 sm:$0xff]  }
  0xe7   :  { %v755_v26 = vld [vmem:[#allocation8 + $0xcc] ss:$16 sps:$4 sm:$0xff]   ;;  %v186_v28 = vrot.slane %v185_v27, 4  ;;  %v757_v29 = vld [vmem:[#allocation8 + $0xc0] ss:$16 sps:$4 sm:$0xff]   ;;  %v1236_v42 = vshrl.u32 %v387_v41, 7 }
  0xe8   :  { %v758_v30 = vld [vmem:[#allocation8 + $0xc8] ss:$16 sps:$4 sm:$0xff]   ;;  %v759_v32 = vld [vmem:[#allocation8 + $0xe4] ss:$16 sps:$4 sm:$0xff]   ;;  %v761_v33 = vld [vmem:[#allocation8 + $0xec] ss:$16 sps:$4 sm:$0xff]  }
  0xe9   :  { %412 = vmatpush1.bf16.msra.mxu0 %v733_v11  ;;  %453 = vmatpush1.bf16.msra.mxu1 %v734_v12  ;;  %v187_v31 = vadd.f32 %v186_v28, %v185_v27  ;;  %v763_v35 = vld [vmem:[#allocation8 + $0xe0] ss:$16 sps:$4 sm:$0xff]   ;;  %v764_v36 = vld [vmem:[#allocation8 + $0xe8] ss:$16 sps:$4 sm:$0xff]   ;;  %v389_v43 = vsub.s32 0, %v1236_v42  ;;  %v397_v44 = vsub.s32 2, %v1236_v42 }
  0xea   :  { %413 = vmatprep.subr.bf16.mxu0 %v735_v13  ;;  %454 = vmatprep.subr.bf16.mxu1 %v737_v14  ;;  %v225_v45 = vld [vmem:[%s1270_s3] sm:$0xf]  ;;  %v393_v46 = vsub.s32 1, %v1236_v42  ;;  %v401_v47 = vsub.s32 3, %v1236_v42  ;;  %vm489_vm0 = vcmask 1040384   ;;  %s1057_s3 = smov [#allocation9]  }
  0xeb   :  { %v188_v34 = vrot.slane %v187_v31, 2  ;;  %v390_v48 = vrot.slane %v225_v45, %v389_v43  ;;  %v398_v49 = vrot.slane %v225_v45, %v397_v44  ;;  %v1056_v28 = vmov 1966171168   ;;  %s566_s29 = sshll.u32 %s1057_s3, 4  ;;  %s567_s29 = int_to_ptr.vmem [resolvable:$true] %s566_s29 }
  0xec   :  { %v394_v50 = vrot.slane %v225_v45, %v393_v46  ;;  %v402_v51 = vrot.slane %v225_v45, %v401_v47  ;;  %vm557_vm1 = vcmp.lt.s32.totalorder %v387_v41, 512  ;;  %s999_s7 = scalar_lea.vmem %s567_s29, 64  ;;  %p1004_p10 = scmp.lt.s32.totalorder %s567_s29, %s567_s29 }
  0xed   :  { %414 = vmatpush1.bf16.msra.mxu0 %v739_v15  ;;  %455 = vmatpush1.bf16.msra.mxu1 %v740_v16  ;;  %v189_v37 = vadd.f32 %v188_v34, %v187_v31  ;;  %p1000_p9 = scmp.ne.s32.totalorder %s567_s29, %s999_s7  ;;  %p1005_p11 = scmp.lt.s32.totalorder %s999_s7, %s999_s7 }
  0xee   :  { %415 = vmatprep.subr.bf16.mxu0 %v741_v17  ;;  %456 = vmatprep.subr.bf16.mxu1 %v743_v18 }
  0xef   :  { %v190_v38 = vrot.slane %v189_v37, 1  ;;  %p1006_p12 = por %p1005_p11, %p1004_p10 }
  0xf1   :  { %416 = vmatpush1.bf16.msra.mxu0 %v745_v19  ;;  %457 = vmatpush1.bf16.msra.mxu1 %v746_v20  ;;  %v191_v39 = vadd.f32 %v190_v38, %v189_v37  ;;  %p1007_p13 = pnand %p1006_p12, %p1000_p9 }
  0xf2   :  { %417 = vmatprep.subr.bf16.mxu0 %v747_v21  ;;  %458 = vmatprep.subr.bf16.mxu1 %v749_v22 }
  0xf3   :  { %v192_v40 = vpack.c.bf16 %v191_v39, %v191_v39 }
  0xf5   :  { %418 = vmatpush1.bf16.msra.mxu0 %v751_v23  ;;  %459 = vmatpush1.bf16.msra.mxu1 %v752_v24 }
  0xf6   :  { %419 = vmatprep.subr.bf16.mxu0 %v753_v25  ;;  %460 = vmatprep.subr.bf16.mxu1 %v755_v26 }
  0xf9   :  { %420 = vmatpush1.bf16.msra.mxu0 %v757_v29  ;;  %461 = vmatpush1.bf16.msra.mxu1 %v758_v30  ;;  %v533_v29 = vunpack.c.l.s4 %v1056_v28 }
  0xfa   :  { %421 = vmatprep.subr.bf16.mxu0 %v759_v32  ;;  %462 = vmatprep.subr.bf16.mxu1 %v761_v33 }
  0xfb   :  { %v534_v30 = vunpack.c.0.s8 %v533_v29 }
  0xfd   :  { %422 = vmatpush1.bf16.msra.mxu0 %v763_v35  ;;  %463 = vmatpush1.bf16.msra.mxu1 %v764_v36  ;;  %v537_v33 = vsub.s32 %v534_v30, %v1236_v42 }
 0x100   :  { %440 = vmatmul.mubr.bf16.vlgmr.msra.gmra.mrb[0].mxu0 %v192_v40  ;;  %481 = vmatmul.mubr.bf16.vlgmr.msra.gmra.mrb[0].mxu1 %v192_v40 }
 0x1d3   :  { %v441_v52 = vpop.f32.mrb[0].mxu0  ;;  %v482_v53 = vpop.f32.mrb[0].mxu1 }
 0x1d4   :  { %v442_v54 = vadd.f32 %v441_v52, %v390_v48  ;;  %v483_v55 = vadd.f32 %v482_v53, %v398_v49  ;;  %v443_v56 = vpop.f32.mrb[1].mxu0  ;;  %v484_v57 = vpop.f32.mrb[1].mxu1 }
 0x1d5   :  { %v444_v58 = vadd.f32 %v443_v56, %v394_v50  ;;  %v485_v59 = vadd.f32 %v484_v57, %v402_v51  ;;  %v445_v60 = vpop.f32.mrb[2].mxu0  ;;  %v486_v61 = vpop.f32.mrb[2].mxu1 }
 0x1d6   :  { %v490_v62 = vsel %vm489_vm0, %v442_v54, -inf  ;;  %v492_v63 = vsel %vm489_vm0, %v483_v55, -inf  ;;  %v446_v0 = vpop.f32.mrb[3].mxu0  ;;  %v487_v1 = vpop.f32.mrb[3].mxu1 }
 0x1d7   :  { %v491_v2 = vsel %vm489_vm0, %v444_v58, -inf  ;;  %v493_v3 = vsel %vm489_vm0, %v485_v59, -inf }
 0x1d8   :  { %v494_v4 = vmax.f32 %v490_v62, %v491_v2  ;;  %v495_v5 = vmax.f32 %v492_v63, %v493_v3 }
 0x1da   :  { %v496_v6 = vmax.f32 %v494_v4, %v495_v5 }
 0x1dc   :  { %497 = vmax.xlane.f32.xlu0 %v496_v6 }
 0x269   :  { %v498_v7 = vpop.xlane.xlu0 %497 }
 0x26a   :  { %v499_v8 = vsub.f32 %v442_v54, %v498_v7  ;;  %v500_v9 = vsub.f32 %v444_v58, %v498_v7  ;;  %v501_v10 = vsub.f32 %v483_v55, %v498_v7  ;;  %v502_v11 = vsub.f32 %v485_v59, %v498_v7 }
 0x26c   :  { %v503_v12 = vmul.f32 1.442695, %v499_v8  ;;  %v505_v13 = vmul.f32 1.442695, %v500_v9  ;;  %v507_v14 = vmul.f32 1.442695, %v501_v10 }
 0x26d   :  { %v509_v15 = vmul.f32 1.442695, %v502_v11 }
 0x26e   :  { %765 = vpow2.f32 %v503_v12 }
 0x26f   :  { %767 = vpow2.f32 %v505_v13 }
 0x270   :  { %769 = vpow2.f32 %v507_v14 }
 0x271   :  { %771 = vpow2.f32 %v509_v15 }
 0x278   :  { %v766_v16 = vpop.eup %765 }
 0x279   :  { %v768_v17 = vpop.eup %767  ;;  %v511_v18 = vsel %vm489_vm0, %v766_v16, 0.0 }
 0x27a   :  { %v770_v19 = vpop.eup %769  ;;  %v512_v20 = vsel %vm489_vm0, %v768_v17, 0.0 }
 0x27b   :  { %v772_v21 = vpop.eup %771  ;;  %v513_v22 = vadd.f32 %v512_v20, %v511_v18  ;;  %v514_v23 = vsel %vm489_vm0, %v770_v19, 0.0 }
 0x27c   :  { %v516_v25 = vsel %vm489_vm0, %v772_v21, 0.0 }
 0x27d   :  { %v515_v24 = vadd.f32 %v514_v23, %v513_v22 }
 0x27f   :  { %v517_v26 = vadd.f32 %v516_v25, %v515_v24 }
 0x281   :  { %518 = vadd.xlane.f32.xlu0 %v517_v26 }
 0x30e   :  { %v519_v27 = vpop.xlane.xlu0 %518 }
 0x30f   :  { %773 = vlog2.f32 %v519_v27 }
 0x319   :  { %v774_v31 = vpop.eup %773 }
 0x31a   :  { %v521_v32 = vmul.f32 0.6931472, %v774_v31 }
 0x31c   :  { %v522_v34 = vsub.f32 %v499_v8, %v521_v32  ;;  %v523_v35 = vsub.f32 %v500_v9, %v521_v32  ;;  %v524_v36 = vsub.f32 %v501_v10, %v521_v32  ;;  %v525_v37 = vsub.f32 %v502_v11, %v521_v32 }
 0x31e   :  { %v530_v38 = vcombine.low %v522_v34, %v523_v35  ;;  %v531_v39 = vcombine.low %v524_v36, %v525_v37 }
 0x320   :  { %v538_v40 = vrot.slane %v530_v38, %v537_v33  ;;  %v545_v43 = vrot.slane %v531_v39, %v537_v33 }
 0x322   :  { %v546_v44 = vcombine.low %v538_v40, %v545_v43 }
 0x324   :  { %v553_v45 = vrot.slane %v546_v44, %v537_v33 }
 0x326   :  { %559 = vst.msk [vmem:[#allocation9] sm:$0xf] %vm557_vm1, %v553_v45 }
 0x327   :  { %1010 = shalt.err (!%p1007_p13)
}
 0x328   :  { %s1011_s30 = scalar_lea.hbm %s1271_s4, 64 }
 0x329   :  { %p1012_p0 = scmp.ne.s32.totalorder %s1271_s4, %s1011_s30  ;;  %p1015_p1 = scmp.lt.u32.totalorder %s1011_s30, %s1271_s4 }
 0x32b   :  { %p1017_p2 = pnand %p1015_p1, %p1012_p0 }
 0x32d   :  { %1020 = shalt.err (!%p1017_p2)
}
 0x32e   :  { %569 = dma.vmem_to_hbm [thread:$0]  %s567_s29, 64, %s1271_s4, [#allocation6]  }
 0x32f   :  { %1041 = dma.done.wait [#allocation6], 64  }
 0x330   :  { %1042 = vsyncadd [#allocation6], 4294967232 }
 0x331   :  { %573 = vsyncpa [#allocation5], 1 }
 0x332   :  { %574 = vsyncpa [#allocation6], 1 }
 0x333   :  { %575 = vsyncpa [#allocation7], 1 }
 0x334   :  { %576 = vsyncmov [#allocation3] }
 0x337   :  { %s577_s10 = vpop.sfrf %576 }
 0x338   :  { %p694_p3 = scmp.ne.s32.totalorder %s577_s10, 0 }
 0x33a   :  { %581 = shalt.err (%p694_p3)  }
 0x33b   :  { %583 = vsyncmov [#allocation3 + $0x1] }
 0x33e   :  { %s584_s11 = vpop.sfrf %583 }
 0x33f   :  { %p695_p4 = scmp.ne.s32.totalorder %s584_s11, 0 }
 0x341   :  { %588 = shalt.err (%p695_p4)  }
 0x342   :  { %590 = vsyncmov [#allocation3 + $0x2] }
 0x345   :  { %s591_s15 = vpop.sfrf %590 }
 0x346   :  { %p696_p5 = scmp.ne.s32.totalorder %s591_s15, 0 }
 0x348   :  { %595 = shalt.err (%p696_p5)  }
 0x349   :  { %597 = vsyncmov [#allocation3 + $0x3] }
 0x34c   :  { %s598_s16 = vpop.sfrf %597 }
 0x34d   :  { %p697_p6 = scmp.ne.s32.totalorder %s598_s16, 0 }
 0x34f   :  { %602 = shalt.err (%p697_p6)  }
 0x350   :  { %604 = vsyncmov [#allocation3 + $0x4] }
 0x353   :  { %s605_s4 = vpop.sfrf %604 }
 0x354   :  { %p698_p7 = scmp.ne.s32.totalorder %s605_s4, 0 }
 0x356   :  { %609 = shalt.err (%p698_p7)  }
 0x357   :  { %611 = vsyncmov [#allocation3 + $0x5] }
 0x35a   :  { %s612_s18 = vpop.sfrf %611 }
 0x35b   :  { %p699_p8 = scmp.ne.s32.totalorder %s612_s18, 0 }
 0x35d   :  { %616 = shalt.err (%p699_p8)  }
 0x35e   :  { %618 = vsyncmov [#allocation3 + $0x6] }
 0x361   :  { %s619_s12 = vpop.sfrf %618 }
 0x362   :  { %p700_p9 = scmp.ne.s32.totalorder %s619_s12, 0 }
 0x364   :  { %623 = shalt.err (%p700_p9)  }
 0x365   :  { %625 = vsyncmov [#allocation3 + $0x7] }
 0x368   :  { %s626_s13 = vpop.sfrf %625 }
 0x369   :  { %p701_p10 = scmp.ne.s32.totalorder %s626_s13, 0 }
 0x36b   :  { %630 = shalt.err (%p701_p10)  }

</bundles_post_ra>
